<compile_context>
chip_gen: v5e
topology: v5e:2x2
jax: 0.10.0
libtpu: 0.0.40
codegen_flags: <defaults>
</compile_context>

<pallas_src>
from functools import reduce
from operator import mul as _mul

import jax
import jax.numpy as jnp
from jax.experimental import pallas as pl
from jax.experimental.pallas import tpu as pltpu

LANE = 128
_FALLBACK_VMEM_BYTES = 64 * 1024 * 1024  # conservative (v7x per-TC VMEM)


def _vmem_budget_bytes():
    """Generation-aware VMEM budget: ~75% of capacity (48 MiB v7x, 96 MiB v6e/v5e)."""
    try:
        cap = int(pltpu.get_tpu_info().vmem_capacity_bytes)
    except Exception:
        cap = _FALLBACK_VMEM_BYTES
    return max(16 * 1024 * 1024, (cap * 3) // 4)


def _sublane_granule(dtype):
    """Native packed sublane multiple: 8 (f32), 16 (bf16/f16), 32 (int8/fp8)."""
    itemsize = jnp.dtype(dtype).itemsize
    return max(8, 32 // max(1, itemsize))


def _round_up(x, m):
    return ((x + m - 1) // m) * m


def _pick_tile_rows(rows, cap_rows, sub):
    """Largest sublane-aligned tile <= cap_rows; prefer an even (>=2) grid step
    count so v7x's two TensorCores get balanced work.  Tiles do NOT have to
    divide `rows` -- the grid uses cdiv and Pallas masks the partial block."""
    cap_rows = max(sub, (cap_rows // sub) * sub)
    tile = max(sub, min(cap_rows, (rows // sub) * sub if rows >= sub else sub))
    steps = pl.cdiv(rows, tile)
    if steps == 1:
        if rows > 2 * sub:
            # Split into ~2 tiles so both v7x TensorCores get work (near-free
            # on single-TC chips: one extra ~0.35 us grid step).
            tile = _round_up(pl.cdiv(rows, 2), sub)
    elif steps % 2 == 1:
        # Re-balance an odd step count to an even one.
        tile = min(cap_rows, _round_up(pl.cdiv(rows, steps + 1), sub))
    return max(sub, tile)


def _make_merge_prod_kernel(n):
    """Kernel: o = x0 * x1 * ... * x{n-1}, all (tile_rows, LANE) VMEM tiles."""

    def kernel(*refs):
        out_ref = refs[n]
        acc = refs[0][...]
        for i in range(1, n):      # n is small & static -> unrolled VPU muls
            acc = acc * refs[i][...]
        out_ref[...] = acc

    return kernel


def merge_prod_pallas(values, *, max_tile_rows=8192,
                      min_pallas_elements=1 << 18, force_pallas=False):
    """Elementwise product of same-shape, same-dtype arrays (reduce(__mul__))."""
    values = tuple(values)
    n = len(values)
    shape = values[0].shape
    dtype = values[0].dtype

    total = 1
    for s in shape:
        total *= s

    # Fallback path: mixed shapes/dtypes (broadcasting/promotion semantics),
    # tiny tensors (launch overhead dominates), or non-lane-divisible sizes.
    homogeneous = all(v.shape == shape and v.dtype == dtype for v in values)
    lane_aligned = total > 0 and (total % LANE == 0)
    if (n == 1 or not homogeneous or not lane_aligned
            or (total < min_pallas_elements and not force_pallas)):
        return reduce(_mul, values)

    itemsize = jnp.dtype(dtype).itemsize
    sub = _sublane_granule(dtype)
    rows = total // LANE

    budget = _vmem_budget_bytes()
    bytes_per_row_all = (n + 1) * 2 * LANE * itemsize   # double-buffered in+out
    cap_by_vmem = max(sub, budget // bytes_per_row_all)
    tile_rows = _pick_tile_rows(rows, min(max_tile_rows, cap_by_vmem), sub)
    grid = (pl.cdiv(rows, tile_rows),)

    tile_bytes = tile_rows * LANE * itemsize
    vmem_needed = (n + 1) * 2 * tile_bytes               # already double-buffered
    vmem_limit = int(min(max(vmem_needed + (4 << 20), 16 << 20), budget))

    # Flatten each value to a lane-dense 2-D slab (metadata reshape for
    # contiguous arrays; transposed inputs would incur an XLA copy here).
    flat = [v.reshape(rows, LANE) for v in values]

    in_specs = [pl.BlockSpec((tile_rows, LANE), lambda i: (i, 0))
                for _ in range(n)]
    out_spec = pl.BlockSpec((tile_rows, LANE), lambda i: (i, 0))

    cost = pl.CostEstimate(
        flops=(n - 1) * total,
        transcendentals=0,
        bytes_accessed=(n + 1) * total * itemsize,
    )

    out = pl.pallas_call(
        _make_merge_prod_kernel(n),
        out_shape=jax.ShapeDtypeStruct((rows, LANE), dtype),
        grid_spec=pltpu.PrefetchScalarGridSpec(
            num_scalar_prefetch=0,
            grid=grid,
            in_specs=in_specs,
            out_specs=out_spec,
        ),
        compiler_params=pltpu.CompilerParams(
            dimension_semantics=("parallel",),
            vmem_limit_bytes=vmem_limit,
        ),
        cost_estimate=cost,
    )(*flat)
    return out.reshape(shape)


class MergeDictsLambdaPallas:
    """JAX/Pallas equivalent of MergeDictsLambda with fn = elementwise product."""

    def __init__(self, keys=('out',), force_pallas=False):
        self.keys = tuple(keys)
        self.force_pallas = force_pallas

    def __call__(self, dicts):
        out = {}
        for key in self.keys:
            out[key] = merge_prod_pallas(
                tuple(d[key] for d in dicts), force_pallas=self.force_pallas)
        return out


if __name__ == "__main__":
    key = jax.random.PRNGKey(0)
    k1, k2, k3 = jax.random.split(key, 3)
    B, C, H, W = 2, 4, 16, 16          # NCHW
    x1 = jax.random.normal(k1, (B, C, H, W), dtype=jnp.float32)
    x2 = jax.random.normal(k2, (B, C, H, W), dtype=jnp.float32)
    x3 = jax.random.normal(k3, (B, C, H, W), dtype=jnp.float32)

    dicts = ({"out": x1}, {"out": x2}, {"out": x3})
    ref = x1 * x2 * x3

    # 1) Pallas path (forced even for this small demo shape).
    module = MergeDictsLambdaPallas(keys=("out",), force_pallas=True)
    out = jax.block_until_ready(module(dicts)["out"])
    assert out.shape == ref.shape and out.dtype == ref.dtype
    assert jnp.allclose(out, ref, atol=1e-6, rtol=1e-6)

    # 2) bf16 path (exercises dtype-aware sublane granule = 16).
    b1, b2, b3 = (x.astype(jnp.bfloat16) for x in (x1, x2, x3))
    bd = ({"out": b1}, {"out": b2}, {"out": b3})
    out_bf16 = jax.block_until_ready(module(bd)["out"])
    ref_bf16 = b1 * b2 * b3
    assert out_bf16.dtype == jnp.bfloat16
    assert jnp.allclose(out_bf16.astype(jnp.float32),
                        ref_bf16.astype(jnp.float32), atol=1e-2, rtol=1e-2)

    # 3) Uneven-grid / partial-last-block path (rows = 120, tile = 64).
    kp1, kp2 = jax.random.split(k3, 2)
    y1 = jax.random.normal(kp1, (3, 5, 8, 128), dtype=jnp.float32)
    y2 = jax.random.normal(kp2, (3, 5, 8, 128), dtype=jnp.float32)
    out_p = jax.block_until_ready(
        module(({"out": y1}, {"out": y2}))["out"])
    assert jnp.allclose(out_p, y1 * y2, atol=1e-6, rtol=1e-6)

    # 4) Default behavior: small-size XLA fast path.
    module_fast = MergeDictsLambdaPallas(keys=("out",))
    out_fast = jax.block_until_ready(module_fast(dicts)["out"])
    assert jnp.allclose(out_fast, ref, atol=1e-6, rtol=1e-6)

    print("KERNEL_OK")
</pallas_src>

<mosaic_0001>
module attributes {stable_mosaic.version = 11 : i64} {
  func.func @kernel(%arg0: i32, %arg1: memref<16x128xf32, #tpu.memory_space<vmem>>, %arg2: memref<16x128xf32, #tpu.memory_space<vmem>>, %arg3: memref<16x128xf32, #tpu.memory_space<vmem>>, %arg4: memref<16x128xf32, #tpu.memory_space<vmem>>) attributes {dimension_semantics = [#tpu.dimension_semantics<parallel>], iteration_bounds = array<i64: 1>, scalar_prefetch = 0 : i64, scratch_operands = 0 : i64, tpu.core_type = #tpu.core_type<tc>, window_params = [{transform_indices = @transform_0, window_bounds = array<i64: 16, 128>}, {transform_indices = @transform_1, window_bounds = array<i64: 16, 128>}, {transform_indices = @transform_2, window_bounds = array<i64: 16, 128>}, {transform_indices = @transform_3, window_bounds = array<i64: 16, 128>}]} {
    %c0 = arith.constant 0 : index
    %c0_0 = arith.constant 0 : index
    %0 = vector.load %arg1[%c0, %c0_0] : memref<16x128xf32, #tpu.memory_space<vmem>>, vector<16x128xf32>
    %c0_1 = arith.constant 0 : index
    %c0_2 = arith.constant 0 : index
    %1 = vector.load %arg2[%c0_1, %c0_2] : memref<16x128xf32, #tpu.memory_space<vmem>>, vector<16x128xf32>
    %2 = arith.mulf %0, %1 : vector<16x128xf32>
    %c0_3 = arith.constant 0 : index
    %c0_4 = arith.constant 0 : index
    %3 = vector.load %arg3[%c0_3, %c0_4] : memref<16x128xf32, #tpu.memory_space<vmem>>, vector<16x128xf32>
    %4 = arith.mulf %2, %3 : vector<16x128xf32>
    %c0_5 = arith.constant 0 : index
    %c0_6 = arith.constant 0 : index
    %5 = vector.load %arg4[%c0_5, %c0_6] : memref<16x128xf32, #tpu.memory_space<vmem>>, vector<16x128xf32>
    tpu.vector_store %arg4[%c0_5, %c0_6], %4 {strides = array<i32>} : memref<16x128xf32, #tpu.memory_space<vmem>>, vector<16x128xf32>,
    return
  }
  func.func @transform_0(%arg0: i32) -> (i32, i32) {
    %c0_i32 = arith.constant 0 : i32
    %c0_i32_0 = arith.constant 0 : i32
    return %arg0, %c0_i32 : i32, i32
  }
  func.func @transform_1(%arg0: i32) -> (i32, i32) {
    %c0_i32 = arith.constant 0 : i32
    %c0_i32_0 = arith.constant 0 : i32
    return %arg0, %c0_i32 : i32, i32
  }
  func.func @transform_2(%arg0: i32) -> (i32, i32) {
    %c0_i32 = arith.constant 0 : i32
    %c0_i32_0 = arith.constant 0 : i32
    return %arg0, %c0_i32 : i32, i32
  }
  func.func @transform_3(%arg0: i32) -> (i32, i32) {
    %c0_i32 = arith.constant 0 : i32
    %c0_i32_0 = arith.constant 0 : i32
    return %arg0, %c0_i32 : i32, i32
  }
}

</mosaic_0001>

<bundles_post_ra>
// kernel: tpu_custom_call.1
= control target key start
LH: loop header
LB: loop body
LE: loop exit
PB: predicated region body
PF: predicated region fallthrough
CT: control target
= control target key end

     0   :  { %8 = vsyncpa [#allocation3], 0  ;;  %s252_s0 = inlined_call_operand.hbm [shape: f32[16,128], index: 0, kind: input, shape index: {}]   ;;  %s253_s1 = inlined_call_operand.hbm [shape: f32[16,128], index: 1, kind: input, shape index: {}]   ;;  %s254_s2 = inlined_call_operand.hbm [shape: f32[16,128], index: 2, kind: input, shape index: {}]   ;;  %s255_s3 = inlined_call_operand.hbm [shape: f32[16,128], index: 3, kind: output, shape index: {}]  }
   0x1   :  { %9 = vsyncpa [#allocation6], 0 }
   0x2   :  { %10 = vsyncpa [#allocation4], 0  ;;  %s28_s14 = sshll.u32 %s253_s1, 4  ;;  %s202_s15 = smov [#allocation5]   ;;  %s29_s14 = int_to_ptr.hbm [resolvable:$true] %s28_s14 }
   0x3   :  { %s30_s16 = sshll.u32 %s202_s15, 4  ;;  %s15_s19 = sshll.u32 %s252_s0, 4  ;;  %s31_s16 = int_to_ptr.vmem [resolvable:$true] %s30_s16  ;;  %s16_s19 = int_to_ptr.hbm [resolvable:$true] %s15_s19 }
   0x4   :  { %s203_s20 = smov 128   ;;  %s204_s21 = smov 8  }
   0x5   :  { %36 = dma.hbm_to_vmem [thread:$0]  %s29_s14, 256, %s31_s16, [#allocation6], %s203_s20, %s203_s20, %s204_s21  }
   0x6   :  { %s205_s22 = smov [#allocation2]   ;;  %s41_s1 = sshll.u32 %s254_s2, 4  ;;  %s42_s1 = int_to_ptr.hbm [resolvable:$true] %s41_s1 }
   0x7   :  { %s17_s23 = sshll.u32 %s205_s22, 4  ;;  %s206_s0 = smov [#allocation7]   ;;  %s18_s23 = int_to_ptr.vmem [resolvable:$true] %s17_s23 }
   0x8   :  { %23 = dma.hbm_to_vmem [thread:$0]  %s16_s19, 256, %s18_s23, [#allocation3], %s203_s20, %s203_s20, %s204_s21  }
   0x9   :  { %s43_s26 = sshll.u32 %s206_s0, 4  ;;  %s44_s26 = int_to_ptr.vmem [resolvable:$true] %s43_s26 }
   0xa   :  { %49 = dma.hbm_to_vmem [thread:$0]  %s42_s1, 256, %s44_s26, [#allocation6], %s203_s20, %s203_s20, %s204_s21  }
   0xb   :  { %196 = dma.done.wait [#allocation3], 256  }
   0xc   :  { %197 = vsyncadd [#allocation3], 4294967040 }
   0xd   :  { %198 = dma.done.wait [#allocation6], 512  }
   0xe   :  { %199 = vsyncadd [#allocation6], 4294966784  ;;  %v62_v0 = vld [vmem:[#allocation2] sm:$0xff]  ;;  %v64_v1 = vld [vmem:[#allocation5] sm:$0xff]  ;;  %s207_s2 = smov [#allocation8]   ;;  %s80_s30 = sshll.u32 %s255_s3, 4  ;;  %s81_s30 = int_to_ptr.hbm [resolvable:$true] %s80_s30 }
   0xf   :  { %v68_v2 = vld [vmem:[#allocation7] sm:$0xff]  ;;  %v66_v3 = vmul.f32 %v64_v1, %v62_v0  ;;  %v63_v4 = vld [vmem:[#allocation2 + $0x8] sm:$0xff]  ;;  %v65_v5 = vld [vmem:[#allocation5 + $0x8] sm:$0xff]  ;;  %s78_s27 = sshll.u32 %s207_s2, 4  ;;  %s79_s27 = int_to_ptr.vmem [resolvable:$true] %s78_s27 }
  0x10   :  { %v69_v6 = vld [vmem:[#allocation7 + $0x8] sm:$0xff]  ;;  %v67_v7 = vmul.f32 %v65_v5, %v63_v4 }
  0x11   :  { %v70_v8 = vmul.f32 %v68_v2, %v66_v3 }
  0x12   :  { %v71_v9 = vmul.f32 %v69_v6, %v67_v7 }
  0x13   :  { %72 = vst [vmem:[#allocation8] sm:$0xff] %v70_v8 }
  0x14   :  { %73 = vst [vmem:[#allocation8 + $0x8] sm:$0xff] %v71_v9 }
  0x15   :  { %86 = dma.vmem_to_hbm [thread:$0]  %s79_s27, 256, %s81_s30, [#allocation4], %s203_s20, %s203_s20, %s204_s21  }
  0x16   :  { %200 = dma.done.wait [#allocation4], 256  }
  0x17   :  { %201 = vsyncadd [#allocation4], 4294967040 }
  0x18   :  { %91 = vsyncpa [#allocation3], 1 }
  0x19   :  { %92 = vsyncpa [#allocation6], 1 }
  0x1a   :  { %93 = vsyncpa [#allocation4], 1 }

</bundles_post_ra>
